<compile_context>
chip_gen: v6e
topology: v6e:2x2x1
jax: 0.10.0
libtpu: 0.0.40
codegen_flags: <defaults>
</compile_context>

<pallas_src>
import functools

import jax
import jax.numpy as jnp
from jax.experimental import pallas as pl
from jax.experimental.pallas import tpu as pltpu


def mlp_kernel(x_ref, w1_ref, b1_ref, w2_ref, b2_ref, w3_ref, b3_ref, o_ref):
    # x_ref tile is (tB, 8); transpose in-VMEM so batch lands on the lane axis.
    xt = x_ref[...].astype(jnp.float32).T                              # (8, tB)

    h1 = jnp.dot(w1_ref[...], xt, preferred_element_type=jnp.float32) + b1_ref[...]
    h1 = jax.nn.sigmoid(h1)                                            # (6, tB)

    h2 = jnp.dot(w2_ref[...], h1, preferred_element_type=jnp.float32) + b2_ref[...]
    h2 = jax.nn.sigmoid(h2)                                            # (4, tB)

    h3 = jnp.dot(w3_ref[...], h2, preferred_element_type=jnp.float32) + b3_ref[...]
    h3 = jax.nn.sigmoid(h3)                                            # (1, tB)

    o_ref[...] = h3.astype(o_ref.dtype)                                # lane-dense store


@functools.partial(jax.jit, static_argnames=("block_rows",))
def mlp_forward(x, params, *, block_rows=4096):
    """x: (B, 8) float32; params: torch-layout weights/biases. Returns (B, 1)."""
    w1, b1 = params["w1"], params["b1"]
    w2, b2 = params["w2"], params["b2"]
    w3, b3 = params["w3"], params["b3"]

    B, in_features = x.shape
    assert in_features == 8
    assert block_rows % 128 == 0  # keeps the (1, tb) output block lane-legal

    # Whole batch in one block when it fits (block == full dim is always
    # layout-legal); otherwise stream 128-multiple blocks over a batch grid
    # with automatic double-buffering.
    tb = B if B <= block_rows else block_rows
    grid = (pl.cdiv(B, tb),)

    resident = lambda shape: pl.BlockSpec(shape, lambda i: (0, 0))

    out_t = pl.pallas_call(
        mlp_kernel,
        out_shape=jax.ShapeDtypeStruct((1, B), x.dtype),
        grid_spec=pltpu.PrefetchScalarGridSpec(
            num_scalar_prefetch=0,
            grid=grid,
            in_specs=[
                pl.BlockSpec((tb, 8), lambda i: (i, 0)),   # streamed batch tile
                resident(w1.shape), resident(b1.shape),    # DMA'd once, stay resident
                resident(w2.shape), resident(b2.shape),
                resident(w3.shape), resident(b3.shape),
            ],
            out_specs=pl.BlockSpec((1, tb), lambda i: (0, i)),
        ),
        compiler_params=pltpu.CompilerParams(
            dimension_semantics=("parallel",),
        ),
    )(x, w1, b1, w2, b2, w3, b3)

    return out_t.T  # (B, 1)


def init_params(key):
    """Deterministic init mimicking torch.nn.Linear's U(-1/sqrt(fan_in), +).

    Weights are stored in the torch (out_features, in_features) layout; biases
    as (out_features, 1) so they broadcast along the lane/batch axis in-kernel.
    """
    def linear_init(k, fan_in, fan_out):
        kw, kb = jax.random.split(k)
        bound = 1.0 / jnp.sqrt(jnp.float32(fan_in))
        w = jax.random.uniform(kw, (fan_out, fan_in), jnp.float32, -bound, bound)
        b = jax.random.uniform(kb, (fan_out, 1), jnp.float32, -bound, bound)
        return w, b

    k1, k2, k3 = jax.random.split(key, 3)
    w1, b1 = linear_init(k1, 8, 6)
    w2, b2 = linear_init(k2, 6, 4)
    w3, b3 = linear_init(k3, 4, 1)
    return {"w1": w1, "b1": b1, "w2": w2, "b2": b2, "w3": w3, "b3": b3}


def reference_forward(x, params):
    h = jax.nn.sigmoid(x @ params["w1"].T + params["b1"].T)
    h = jax.nn.sigmoid(h @ params["w2"].T + params["b2"].T)
    h = jax.nn.sigmoid(h @ params["w3"].T + params["b3"].T)
    return h


if __name__ == "__main__":
    key = jax.random.PRNGKey(0)
    k_params, k_small, k_mid, k_big = jax.random.split(key, 4)

    params = init_params(k_params)

    # Small case matching the module spec (batch=8, in_features=8): single block.
    x_small = jax.random.normal(k_small, (8, 8), jnp.float32)
    out_small = jax.block_until_ready(mlp_forward(x_small, params))
    ref_small = reference_forward(x_small, params)
    assert out_small.shape == (8, 1), out_small.shape
    assert jnp.allclose(out_small, ref_small, atol=1e-5, rtol=1e-5)

    # Multi-block case with a partial final block (640 = 2*256 + 128):
    # exercises the batch grid and auto double-buffering.
    x_mid = jax.random.normal(k_mid, (640, 8), jnp.float32)
    out_mid = jax.block_until_ready(mlp_forward(x_mid, params, block_rows=256))
    ref_mid = reference_forward(x_mid, params)
    assert out_mid.shape == (640, 1), out_mid.shape
    assert jnp.allclose(out_mid, ref_mid, atol=1e-5, rtol=1e-5)

    # Default-block streaming path (B > 4096) with a partial final block.
    x_big = jax.random.normal(k_big, (4096 + 512, 8), jnp.float32)
    out_big = jax.block_until_ready(mlp_forward(x_big, params))
    ref_big = reference_forward(x_big, params)
    assert out_big.shape == (4608, 1), out_big.shape
    assert jnp.allclose(out_big, ref_big, atol=1e-5, rtol=1e-5)

    print("KERNEL_OK")
</pallas_src>

<mosaic_0001>
module attributes {stable_mosaic.version = 11 : i64} {
  func.func @mlp_kernel(%arg0: i32, %arg1: memref<8x8xf32, #tpu.memory_space<vmem>>, %arg2: memref<6x8xf32, #tpu.memory_space<vmem>>, %arg3: memref<6x1xf32, #tpu.memory_space<vmem>>, %arg4: memref<4x6xf32, #tpu.memory_space<vmem>>, %arg5: memref<4x1xf32, #tpu.memory_space<vmem>>, %arg6: memref<1x4xf32, #tpu.memory_space<vmem>>, %arg7: memref<1x1xf32, #tpu.memory_space<vmem>>, %arg8: memref<1x8xf32, #tpu.memory_space<vmem>>) attributes {dimension_semantics = [#tpu.dimension_semantics<parallel>], iteration_bounds = array<i64: 1>, scalar_prefetch = 0 : i64, scratch_operands = 0 : i64, tpu.core_type = #tpu.core_type<tc>, window_params = [{transform_indices = @transform_0, window_bounds = array<i64: 8, 8>}, {pipeline_mode = #tpu.pipeline_mode<synchronous>, transform_indices = @transform_1, window_bounds = array<i64: 6, 8>}, {pipeline_mode = #tpu.pipeline_mode<synchronous>, transform_indices = @transform_2, window_bounds = array<i64: 6, 1>}, {pipeline_mode = #tpu.pipeline_mode<synchronous>, transform_indices = @transform_3, window_bounds = array<i64: 4, 6>}, {pipeline_mode = #tpu.pipeline_mode<synchronous>, transform_indices = @transform_4, window_bounds = array<i64: 4, 1>}, {pipeline_mode = #tpu.pipeline_mode<synchronous>, transform_indices = @transform_5, window_bounds = array<i64: 1, 4>}, {pipeline_mode = #tpu.pipeline_mode<synchronous>, transform_indices = @transform_6, window_bounds = array<i64: 1, 1>}, {transform_indices = @transform_7, window_bounds = array<i64: 1, 8>}]} {
    %c0 = arith.constant 0 : index
    %c0_0 = arith.constant 0 : index
    %0 = vector.load %arg1[%c0, %c0_0] : memref<8x8xf32, #tpu.memory_space<vmem>>, vector<8x8xf32>
    %1 = tpu.transpose %0, [1, 0] : vector<8x8xf32> -> vector<8x8xf32>
    %c0_1 = arith.constant 0 : index
    %c0_2 = arith.constant 0 : index
    %2 = vector.load %arg2[%c0_1, %c0_2] : memref<6x8xf32, #tpu.memory_space<vmem>>, vector<6x8xf32>
    %cst = arith.constant dense<0.000000e+00> : vector<6x8xf32>
    %3 = tpu.matmul %2, %1, %cst {dimension_numbers = #tpu.dot_dimension_numbers<[1], [0], [0], [1], [0, 0, 1, 1], [], []>} : vector<6x8xf32>, vector<8x8xf32>, vector<6x8xf32> -> vector<6x8xf32>
    %c0_3 = arith.constant 0 : index
    %c0_4 = arith.constant 0 : index
    %4 = vector.load %arg3[%c0_3, %c0_4] : memref<6x1xf32, #tpu.memory_space<vmem>>, vector<6x1xf32>
    %5 = vector.broadcast %4 : vector<6x1xf32> to vector<6x8xf32>
    %6 = arith.addf %3, %5 : vector<6x8xf32>
    %7 = arith.negf %6 : vector<6x8xf32>
    %8 = math.exp %7 : vector<6x8xf32>
    %cst_5 = arith.constant 1.000000e+00 : f32
    %9 = vector.broadcast %cst_5 : f32 to vector<6x8xf32>
    %10 = arith.addf %9, %8 : vector<6x8xf32>
    %11 = arith.divf %9, %10 : vector<6x8xf32>
    %c0_6 = arith.constant 0 : index
    %c0_7 = arith.constant 0 : index
    %12 = vector.load %arg4[%c0_6, %c0_7] : memref<4x6xf32, #tpu.memory_space<vmem>>, vector<4x6xf32>
    %cst_8 = arith.constant dense<0.000000e+00> : vector<4x8xf32>
    %13 = tpu.matmul %12, %11, %cst_8 {dimension_numbers = #tpu.dot_dimension_numbers<[1], [0], [0], [1], [0, 0, 1, 1], [], []>} : vector<4x6xf32>, vector<6x8xf32>, vector<4x8xf32> -> vector<4x8xf32>
    %c0_9 = arith.constant 0 : index
    %c0_10 = arith.constant 0 : index
    %14 = vector.load %arg5[%c0_9, %c0_10] : memref<4x1xf32, #tpu.memory_space<vmem>>, vector<4x1xf32>
    %15 = vector.broadcast %14 : vector<4x1xf32> to vector<4x8xf32>
    %16 = arith.addf %13, %15 : vector<4x8xf32>
    %17 = arith.negf %16 : vector<4x8xf32>
    %18 = math.exp %17 : vector<4x8xf32>
    %cst_11 = arith.constant 1.000000e+00 : f32
    %19 = vector.broadcast %cst_11 : f32 to vector<4x8xf32>
    %20 = arith.addf %19, %18 : vector<4x8xf32>
    %21 = arith.divf %19, %20 : vector<4x8xf32>
    %c0_12 = arith.constant 0 : index
    %c0_13 = arith.constant 0 : index
    %22 = vector.load %arg6[%c0_12, %c0_13] : memref<1x4xf32, #tpu.memory_space<vmem>>, vector<1x4xf32>
    %cst_14 = arith.constant dense<0.000000e+00> : vector<1x8xf32>
    %23 = tpu.matmul %22, %21, %cst_14 {dimension_numbers = #tpu.dot_dimension_numbers<[1], [0], [0], [1], [0, 0, 1, 1], [], []>} : vector<1x4xf32>, vector<4x8xf32>, vector<1x8xf32> -> vector<1x8xf32>
    %c0_15 = arith.constant 0 : index
    %c0_16 = arith.constant 0 : index
    %24 = vector.load %arg7[%c0_15, %c0_16] : memref<1x1xf32, #tpu.memory_space<vmem>>, vector<1x1xf32>
    %25 = vector.broadcast %24 : vector<1x1xf32> to vector<1x8xf32>
    %26 = arith.addf %23, %25 : vector<1x8xf32>
    %27 = arith.negf %26 : vector<1x8xf32>
    %28 = math.exp %27 : vector<1x8xf32>
    %cst_17 = arith.constant 1.000000e+00 : f32
    %29 = vector.broadcast %cst_17 : f32 to vector<1x8xf32>
    %30 = arith.addf %29, %28 : vector<1x8xf32>
    %31 = arith.divf %29, %30 : vector<1x8xf32>
    %c0_18 = arith.constant 0 : index
    %c0_19 = arith.constant 0 : index
    %32 = vector.load %arg8[%c0_18, %c0_19] : memref<1x8xf32, #tpu.memory_space<vmem>>, vector<1x8xf32>
    tpu.vector_store %arg8[%c0_18, %c0_19], %31 {strides = array<i32>} : memref<1x8xf32, #tpu.memory_space<vmem>>, vector<1x8xf32>,
    return
  }
  func.func @transform_0(%arg0: i32) -> (i32, i32) {
    %c0_i32 = arith.constant 0 : i32
    %c0_i32_0 = arith.constant 0 : i32
    return %arg0, %c0_i32 : i32, i32
  }
  func.func @transform_1(%arg0: i32) -> (i32, i32) {
    %c0_i32 = arith.constant 0 : i32
    %c0_i32_0 = arith.constant 0 : i32
    %c0_i32_1 = arith.constant 0 : i32
    return %c0_i32, %c0_i32_0 : i32, i32
  }
  func.func @transform_2(%arg0: i32) -> (i32, i32) {
    %c0_i32 = arith.constant 0 : i32
    %c0_i32_0 = arith.constant 0 : i32
    %c0_i32_1 = arith.constant 0 : i32
    return %c0_i32, %c0_i32_0 : i32, i32
  }
  func.func @transform_3(%arg0: i32) -> (i32, i32) {
    %c0_i32 = arith.constant 0 : i32
    %c0_i32_0 = arith.constant 0 : i32
    %c0_i32_1 = arith.constant 0 : i32
    return %c0_i32, %c0_i32_0 : i32, i32
  }
  func.func @transform_4(%arg0: i32) -> (i32, i32) {
    %c0_i32 = arith.constant 0 : i32
    %c0_i32_0 = arith.constant 0 : i32
    %c0_i32_1 = arith.constant 0 : i32
    return %c0_i32, %c0_i32_0 : i32, i32
  }
  func.func @transform_5(%arg0: i32) -> (i32, i32) {
    %c0_i32 = arith.constant 0 : i32
    %c0_i32_0 = arith.constant 0 : i32
    %c0_i32_1 = arith.constant 0 : i32
    return %c0_i32, %c0_i32_0 : i32, i32
  }
  func.func @transform_6(%arg0: i32) -> (i32, i32) {
    %c0_i32 = arith.constant 0 : i32
    %c0_i32_0 = arith.constant 0 : i32
    %c0_i32_1 = arith.constant 0 : i32
    return %c0_i32, %c0_i32_0 : i32, i32
  }
  func.func @transform_7(%arg0: i32) -> (i32, i32) {
    %c0_i32 = arith.constant 0 : i32
    %c0_i32_0 = arith.constant 0 : i32
    return %c0_i32, %arg0 : i32, i32
  }
}

</mosaic_0001>

<bundles_post_ra>
// kernel: mlp_forward.1
= control target key start
LH: loop header
LB: loop body
LE: loop exit
PB: predicated region body
PF: predicated region fallthrough
CT: control target
= control target key end

     0   :  { %s465_s0 = inlined_call_operand.vmem [shape: f32[8,8], index: 0, kind: input, shape index: {}]   ;;  %s466_s1 = inlined_call_operand.vmem [shape: f32[6,8], index: 1, kind: input, shape index: {}]   ;;  %s467_s2 = inlined_call_operand.vmem [shape: f32[6,1], index: 2, kind: input, shape index: {}]   ;;  %s468_s3 = inlined_call_operand.vmem [shape: f32[4,6], index: 3, kind: input, shape index: {}]   ;;  %s469_s4 = inlined_call_operand.vmem [shape: f32[4,1], index: 4, kind: input, shape index: {}]   ;;  %s470_s5 = inlined_call_operand.vmem [shape: f32[1,4], index: 5, kind: input, shape index: {}]   ;;  %s471_s6 = inlined_call_operand.<no memory space> [shape: f32[1,1], index: 6, kind: input, shape index: {}]   ;;  %s472_s7 = inlined_call_operand.hbm [shape: f32[1,8], index: 7, kind: output, shape index: {}]  }
   0x1   :  { %v12_v0 = vstv %s471_s6 }
   0x2   :  { %13 = vst [vmem:[#allocation2] sm:$0x1] %v12_v0 }
   0x3   :  { %v29_v1 = vld [vmem:[%s465_s0] sm:$0xff]  ;;  %vm37_vm0 = vcmask 64512   ;;  %v392_v2 = vmov 0.0   ;;  %vm393_vm1 = vmmov 0   ;;  %v394_v5 = vmov 0  }
   0x4   :  { %337 = vmatprep.subr.mxu0 %v392_v2  ;;  %339 = vmatprep.mubr.msk.f32.mxu0 %vm393_vm1, %v392_v2  ;;  %v31_v3 = vld [vmem:[%s467_s2] sm:$0x3f] }
   0x5   :  { %338 = vmatpush3.xpose.msk.msra.mxu0 %vm37_vm0, %v29_v1  ;;  %v30_v4 = vld [vmem:[%s466_s1] sm:$0x3f]  ;;  %356 = vset.pattern.permute.xlu0 %v394_v5 }
   0x6   :  { %14 = vsyncpa [#allocation4], 0  ;;  %34 = vperm.xlu0 %356, %v31_v3   ;;  %342 = vmatprep.subr.mxu1 %v392_v2  ;;  %v121_v6 = vld [vmem:[%s469_s4] sm:$0xf]  ;;  %vm131_vm2 = vcmask 1045504   ;;  %vm127_vm3 = vcmask 48128   ;;  %v218_v26 = vlaneseq }
   0x7   :  { %344 = vmatprep.mubr.msk.f32.mxu1 %vm393_vm1, %v392_v2  ;;  %357 = vset.pattern.permute.xlu1 %v394_v5  ;;  %v120_v14 = vld [vmem:[%s468_s3] sm:$0xf]  ;;  %vm226_vm4 = vcmask 1043456   ;;  %vm222_vm5 = vcmask 31744   ;;  %s395_s9 = smov [#allocation3]   ;;  %vm306_vm6 = vcmask 57344  }
   0x8   :  { %340 = vmatmul.mubr.msk.f32.vlgmr.msra.gmra.mxu0 %vm37_vm0, %v30_v4  ;;  %v211_v24 = vld [vmem:[%s470_s5] sm:$0x1]  ;;  %v219_v27 = vshrl.u32 %v218_v26, 7  ;;  %s314_s10 = sshll.u32 %s395_s9, 4  ;;  %s315_s10 = int_to_ptr.vmem [resolvable:$true] %s314_s10 }
   0x9   :  { %v212_v16 = vld [vmem:[#allocation2] sm:$0x1]  ;;  %s370_s5 = scalar_lea.vmem %s315_s10, 16  ;;  %s374_s11 = scalar_lea.vmem %s315_s10, 32 }
   0xa   :  { %124 = vperm.xlu0 %356, %v121_v6   ;;  %215 = vperm.xlu1 %357, %v212_v16   ;;  %v220_v28 = vsub.s32 0, %v219_v27  ;;  %p371_p0 = scmp.ne.s32.totalorder %s315_s10, %s370_s5  ;;  %p375_p1 = scmp.lt.s32.totalorder %s315_s10, %s315_s10 }
   0xb   :  { %p376_p2 = scmp.lt.s32.totalorder %s374_s11, %s370_s5 }
   0xd   :  { %p377_p3 = por %p376_p2, %p375_p1 }
   0xf   :  { %p378_p4 = pnand %p377_p3, %p371_p0 }
  0x81   :  { %v35_v7 = vpop.permute.xlu0 %34 }
  0x85   :  { %v125_v17 = vpop.permute.xlu0 %124  ;;  %v216_v29 = vpop.permute.xlu1 %215 }
  0x86   :  { %v221_v30 = vrot.slane %v216_v29, %v220_v28 }
  0xc8   :  { %v110_v8 = vpop.f32.mrf.mxu0 }
  0xc9   :  { %v111_v9 = vadd.f32 %v110_v8, %v35_v7 }
  0xca   :  { %v341_v10 = vpop.f32.mrf.mxu0 }
  0xcb   :  { %v324_v11 = vmul.f32 -1.442695, %v111_v9 }
  0xcd   :  { %358 = vpow2.f32 %v324_v11 }
  0xda   :  { %v359_v12 = vpop.eup %358 }
  0xdb   :  { %v117_v13 = vadd.f32 1.0, %v359_v12 }
  0xdd   :  { %360 = vrcp.f32 %v117_v13 }
  0xea   :  { %v361_v15 = vpop.eup %360 }
  0xeb   :  { %343 = vmatpush3.msk.msra.mxu1 %vm131_vm2, %v361_v15 }
  0xec   :  { %345 = vmatmul.mubr.msk.f32.vlgmr.msra.gmra.mxu1 %vm127_vm3, %v120_v14  ;;  %347 = vmatprep.subr.mxu1 %v392_v2 }
  0xed   :  { %349 = vmatprep.mubr.msk.f32.mxu1 %vm393_vm1, %v392_v2 }
 0x1ac   :  { %v201_v18 = vpop.f32.mrf.mxu1 }
 0x1ad   :  { %v202_v19 = vadd.f32 %v201_v18, %v125_v17 }
 0x1ae   :  { %v346_v20 = vpop.f32.mrf.mxu1 }
 0x1af   :  { %v327_v21 = vmul.f32 -1.442695, %v202_v19 }
 0x1b1   :  { %362 = vpow2.f32 %v327_v21 }
 0x1be   :  { %v363_v22 = vpop.eup %362 }
 0x1bf   :  { %v208_v23 = vadd.f32 1.0, %v363_v22 }
 0x1c1   :  { %364 = vrcp.f32 %v208_v23 }
 0x1ce   :  { %v365_v25 = vpop.eup %364 }
 0x1cf   :  { %348 = vmatpush3.msk.msra.mxu1 %vm226_vm4, %v365_v25 }
 0x1d0   :  { %350 = vmatmul.mubr.msk.f32.vlgmr.msra.gmra.mxu1 %vm222_vm5, %v211_v24 }
 0x290   :  { %v296_v31 = vpop.f32.mrf.mxu1 }
 0x291   :  { %v297_v32 = vadd.f32 %v296_v31, %v221_v30 }
 0x292   :  { %v351_v33 = vpop.f32.mrf.mxu1 }
 0x293   :  { %v330_v34 = vmul.f32 -1.442695, %v297_v32 }
 0x295   :  { %366 = vpow2.f32 %v330_v34 }
 0x2a2   :  { %v367_v35 = vpop.eup %366 }
 0x2a3   :  { %v303_v36 = vadd.f32 1.0, %v367_v35 }
 0x2a5   :  { %368 = vrcp.f32 %v303_v36 }
 0x2b2   :  { %v369_v37 = vpop.eup %368 }
 0x2b3   :  { %307 = vst.msk [vmem:[#allocation3] sm:$0x1] %vm306_vm6, %v369_v37 }
 0x2b4   :  { %381 = shalt.err (!%p378_p4)
}
 0x2b5   :  { %317 = dma.vmem_to_hbm [thread:$0]  %s315_s10, 16, %s472_s7, [#allocation4]  }
 0x2b6   :  { %390 = dma.done.wait [#allocation4], 16  }
 0x2b7   :  { %391 = vsyncadd [#allocation4], 4294967280 }
 0x2b8   :  { %321 = vsyncpa [#allocation4], 1 }

</bundles_post_ra>
